<compile_context>
chip_gen: v5e
topology: v5e:2x2
jax: 0.10.0
libtpu: 0.0.40
codegen_flags: <defaults>
</compile_context>

<pallas_src>
import functools

import jax
import jax.numpy as jnp
from jax.experimental import pallas as pl
from jax.experimental.pallas import tpu as pltpu

NEG_SLOPE = 0.01   # nn.LeakyReLU default negative_slope
LANE = 128         # keep every HBM-touching last dim a multiple of this
SUBLANE = 8


def _round_up(n, m):
    return ((n + m - 1) // m) * m


def _pad128(n):
    return _round_up(n, LANE)


# ---------------------------------------------------------------------------
# Fused kernel: entire VAE forward for one batch tile
# ---------------------------------------------------------------------------
def _fused_vae_kernel(*refs, n_enc, n_dec, lat_pad):
    """refs = [x, eps,
               (W, b) * n_enc encoder layers,
               (W_cat, b_cat) fused mu||log_var head,
               (W, b) * n_dec decoder layers (last has no activation),
               recon_out, mu_out, logvar_out]

    Weights: bf16 [Din_p, Dout_p]; biases: f32 [1, Dout_p]; feature dims padded
    to multiples of 128 with zeros so the padding never leaks downstream.
    """
    n_layers = n_enc + 1 + n_dec
    x_ref, eps_ref = refs[0], refs[1]
    w_refs = refs[2:2 + 2 * n_layers]
    recon_ref, mu_ref, logvar_ref = refs[2 + 2 * n_layers:]

    def dense(h_f32, w_ref, b_ref, act):
        # bf16 MXU matmul, f32 accumulate; bias/activation stay f32.
        y = jnp.dot(h_f32.astype(w_ref.dtype), w_ref[...],
                    preferred_element_type=jnp.float32)
        y = y + b_ref[...]                     # [1, Dout_p] broadcast over batch
        if act:
            y = jnp.where(y >= 0, y, NEG_SLOPE * y)
        return y

    # ---- encoder -----------------------------------------------------------
    h = x_ref[...].astype(jnp.float32)
    idx = 0
    for _ in range(n_enc):
        h = dense(h, w_refs[idx], w_refs[idx + 1], True)
        idx += 2

    # ---- fused fc_mu || fc_log_var head (one MXU pass), split at 128-aligned
    # boundary, then reparameterize in-kernel ---------------------------------
    stats = dense(h, w_refs[idx], w_refs[idx + 1], False)
    idx += 2
    mu = stats[:, :lat_pad]
    log_var = stats[:, lat_pad:]
    mu_ref[...] = mu.astype(mu_ref.dtype)
    logvar_ref[...] = log_var.astype(logvar_ref.dtype)

    std = jnp.exp(0.5 * log_var)               # EUP
    d = mu + eps_ref[...].astype(jnp.float32) * std

    # ---- decoder (activation on all layers except the last) ----------------
    for li in range(n_dec):
        d = dense(d, w_refs[idx], w_refs[idx + 1], li < n_dec - 1)
        idx += 2
    recon_ref[...] = d.astype(recon_ref.dtype)


# ---------------------------------------------------------------------------
# Wrapper: padding, BlockSpecs, grid over batch
# ---------------------------------------------------------------------------
def vae_forward(packed, x, eps, *, input_dim, latent_dim, max_block_b=256):
    """packed: output of pack_vae_params(). x: [B, input_dim], eps: [B, latent]."""
    n_enc = len(packed["enc"])
    n_dec = len(packed["dec"])
    head_w, _ = packed["head"]
    lat_pad = head_w.shape[1] // 2
    din_pad = packed["enc"][0][0].shape[0]
    out_pad = packed["dec"][-1][0].shape[1]

    B = x.shape[0]
    block_b = min(_round_up(B, SUBLANE), max_block_b)
    Bp = _round_up(B, block_b)
    grid = (Bp // block_b,)

    # zero-pad activations to lane-dense shapes (padding is provably inert)
    x_p = jnp.zeros((Bp, din_pad), jnp.float32).at[:B, :x.shape[1]].set(x)
    eps_p = jnp.zeros((Bp, lat_pad), jnp.float32).at[:B, :eps.shape[1]].set(eps)

    layers = list(packed["enc"]) + [packed["head"]] + list(packed["dec"])
    inputs = [x_p, eps_p]
    in_specs = [
        pl.BlockSpec((block_b, din_pad), lambda i: (i, 0)),
        pl.BlockSpec((block_b, lat_pad), lambda i: (i, 0)),
    ]
    for (w, b) in layers:
        inputs += [w, b]
        # whole-array blocks with constant index_map -> weights stay VMEM-resident
        in_specs += [pl.BlockSpec(w.shape, lambda i: (0, 0)),
                     pl.BlockSpec(b.shape, lambda i: (0, 0))]

    out_shape = (
        jax.ShapeDtypeStruct((Bp, out_pad), jnp.float32),
        jax.ShapeDtypeStruct((Bp, lat_pad), jnp.float32),
        jax.ShapeDtypeStruct((Bp, lat_pad), jnp.float32),
    )
    out_specs = (
        pl.BlockSpec((block_b, out_pad), lambda i: (i, 0)),
        pl.BlockSpec((block_b, lat_pad), lambda i: (i, 0)),
        pl.BlockSpec((block_b, lat_pad), lambda i: (i, 0)),
    )

    flops = 2 * Bp * sum(int(w.shape[0]) * int(w.shape[1]) for (w, _) in layers)
    bytes_accessed = sum(int(a.size) * a.dtype.itemsize for a in inputs)
    bytes_accessed += Bp * (out_pad + 2 * lat_pad) * 4
    cost = pl.CostEstimate(flops=flops,
                           transcendentals=Bp * lat_pad,
                           bytes_accessed=bytes_accessed)

    kernel = functools.partial(_fused_vae_kernel,
                               n_enc=n_enc, n_dec=n_dec, lat_pad=lat_pad)

    recon_p, mu_p, logvar_p = pl.pallas_call(
        kernel,
        grid=grid,
        in_specs=in_specs,
        out_specs=out_specs,
        out_shape=out_shape,
        compiler_params=pltpu.CompilerParams(
            dimension_semantics=("parallel",)),   # batch axis: megacore / 2 TCs
        cost_estimate=cost,
    )(*inputs)

    return (recon_p[:B, :input_dim],
            mu_p[:B, :latent_dim],
            logvar_p[:B, :latent_dim])


# ---------------------------------------------------------------------------
# Parameter construction (mimics torch.nn.Linear default init:
# U(-1/sqrt(fan_in), 1/sqrt(fan_in)) for weight and bias). Logical layout is
# [Din, Dout] so each layer is x @ W + b (== PyTorch x @ W.T).
# ---------------------------------------------------------------------------
def _init_linear(key, din, dout):
    kw, kb = jax.random.split(key)
    bound = 1.0 / jnp.sqrt(jnp.float32(din))
    w = jax.random.uniform(kw, (din, dout), jnp.float32, -bound, bound)
    b = jax.random.uniform(kb, (dout,), jnp.float32, -bound, bound)
    return w, b


def init_vae_params(key, input_dim, hidden_sizes, latent_dim):
    params = {"encoder": [], "decoder": []}
    din = input_dim
    for h in hidden_sizes:
        key, sub = jax.random.split(key)
        params["encoder"].append(_init_linear(sub, din, h))
        din = h
    key, sub = jax.random.split(key)
    params["fc_mu"] = _init_linear(sub, hidden_sizes[-1], latent_dim)
    key, sub = jax.random.split(key)
    params["fc_log_var"] = _init_linear(sub, hidden_sizes[-1], latent_dim)
    din = latent_dim
    for h in hidden_sizes[::-1]:
        key, sub = jax.random.split(key)
        params["decoder"].append(_init_linear(sub, din, h))
        din = h
    key, sub = jax.random.split(key)
    params["decoder_out"] = _init_linear(sub, din, input_dim)
    return params


def pack_vae_params(params, dtype=jnp.bfloat16):
    """Pad all feature dims to multiples of 128 (zeros), cast weights to bf16,
    keep biases f32, and fuse fc_mu/fc_log_var into one [H_p, 2*latent_p] layer."""
    def pack_layer(w, b):
        din, dout = w.shape
        dp, op = _pad128(din), _pad128(dout)
        wp = jnp.pad(w, ((0, dp - din), (0, op - dout))).astype(dtype)
        bp = jnp.pad(b, (0, op - dout)).reshape(1, op).astype(jnp.float32)
        return wp, bp

    enc = [pack_layer(w, b) for (w, b) in params["encoder"]]

    wm, bm = params["fc_mu"]
    wl, bl = params["fc_log_var"]
    h_last, lat = wm.shape
    hp, lp = _pad128(h_last), _pad128(lat)
    w_cat = jnp.zeros((hp, 2 * lp), jnp.float32)
    w_cat = w_cat.at[:h_last, :lat].set(wm).at[:h_last, lp:lp + lat].set(wl)
    b_cat = jnp.zeros((1, 2 * lp), jnp.float32)
    b_cat = b_cat.at[0, :lat].set(bm).at[0, lp:lp + lat].set(bl)
    head = (w_cat.astype(dtype), b_cat)

    dec = [pack_layer(w, b) for (w, b) in params["decoder"]]
    dec.append(pack_layer(*params["decoder_out"]))
    return {"enc": enc, "head": head, "dec": dec}


# ---------------------------------------------------------------------------
# Pure-jnp reference doing the identical padded bf16-weight / f32-accumulate
# math (for a tight correctness check against the kernel).
# ---------------------------------------------------------------------------
def vae_forward_ref(packed, x, eps):
    lat_pad = packed["head"][0].shape[1] // 2
    din_pad = packed["enc"][0][0].shape[0]
    B, in_dim = x.shape
    lat = eps.shape[1]
    x_p = jnp.zeros((B, din_pad), jnp.float32).at[:, :in_dim].set(x)
    eps_p = jnp.zeros((B, lat_pad), jnp.float32).at[:, :lat].set(eps)

    def dense(h, w, b, act):
        y = jnp.dot(h.astype(w.dtype), w, preferred_element_type=jnp.float32) + b
        return jnp.where(y >= 0, y, NEG_SLOPE * y) if act else y

    h = x_p
    for (w, b) in packed["enc"]:
        h = dense(h, w, b, True)
    stats = dense(h, *packed["head"], False)
    mu, log_var = stats[:, :lat_pad], stats[:, lat_pad:]
    d = mu + eps_p * jnp.exp(0.5 * log_var)
    n_dec = len(packed["dec"])
    for i, (w, b) in enumerate(packed["dec"]):
        d = dense(d, w, b, i < n_dec - 1)
    return d[:, :in_dim], mu[:, :lat], log_var[:, :lat]


if __name__ == "__main__":
    input_dim = 32
    hidden_sizes = [64, 32]
    latent_dim = 16
    batch = 8

    key = jax.random.PRNGKey(0)
    kp, kx, ke = jax.random.split(key, 3)

    params = init_vae_params(kp, input_dim, hidden_sizes, latent_dim)
    packed = pack_vae_params(params)                       # bf16 weights, padded
    x = jax.random.normal(kx, (batch, input_dim), jnp.float32)
    # torch.randn_like(std) is made an explicit deterministic input.
    eps = jax.random.normal(ke, (batch, latent_dim), jnp.float32)

    fwd = jax.jit(functools.partial(vae_forward,
                                    input_dim=input_dim, latent_dim=latent_dim))
    recon, mu, log_var = fwd(packed, x, eps)
    jax.block_until_ready((recon, mu, log_var))

    r_ref, mu_ref, lv_ref = vae_forward_ref(packed, x, eps)
    assert recon.shape == (batch, input_dim)
    assert mu.shape == (batch, latent_dim)
    assert log_var.shape == (batch, latent_dim)
    assert jnp.allclose(recon, r_ref, atol=1e-3, rtol=1e-3)
    assert jnp.allclose(mu, mu_ref, atol=1e-3, rtol=1e-3)
    assert jnp.allclose(log_var, lv_ref, atol=1e-3, rtol=1e-3)

    print("KERNEL_OK")
</pallas_src>

<mosaic_0001>
module attributes {stable_mosaic.version = 11 : i64} {
  func.func @_fused_vae_kernel(%arg0: i32, %arg1: memref<8x128xf32, #tpu.memory_space<vmem>>, %arg2: memref<8x128xf32, #tpu.memory_space<vmem>>, %arg3: memref<128x128xbf16, #tpu.memory_space<vmem>>, %arg4: memref<1x128xf32, #tpu.memory_space<vmem>>, %arg5: memref<128x128xbf16, #tpu.memory_space<vmem>>, %arg6: memref<1x128xf32, #tpu.memory_space<vmem>>, %arg7: memref<128x256xbf16, #tpu.memory_space<vmem>>, %arg8: memref<1x256xf32, #tpu.memory_space<vmem>>, %arg9: memref<128x128xbf16, #tpu.memory_space<vmem>>, %arg10: memref<1x128xf32, #tpu.memory_space<vmem>>, %arg11: memref<128x128xbf16, #tpu.memory_space<vmem>>, %arg12: memref<1x128xf32, #tpu.memory_space<vmem>>, %arg13: memref<128x128xbf16, #tpu.memory_space<vmem>>, %arg14: memref<1x128xf32, #tpu.memory_space<vmem>>, %arg15: memref<8x128xf32, #tpu.memory_space<vmem>>, %arg16: memref<8x128xf32, #tpu.memory_space<vmem>>, %arg17: memref<8x128xf32, #tpu.memory_space<vmem>>) attributes {dimension_semantics = [#tpu.dimension_semantics<parallel>], iteration_bounds = array<i64: 1>, scalar_prefetch = 0 : i64, scratch_operands = 0 : i64, tpu.core_type = #tpu.core_type<tc>, window_params = [{transform_indices = @transform_0, window_bounds = array<i64: 8, 128>}, {transform_indices = @transform_1, window_bounds = array<i64: 8, 128>}, {pipeline_mode = #tpu.pipeline_mode<synchronous>, transform_indices = @transform_2, window_bounds = array<i64: 128, 128>}, {pipeline_mode = #tpu.pipeline_mode<synchronous>, transform_indices = @transform_3, window_bounds = array<i64: 1, 128>}, {pipeline_mode = #tpu.pipeline_mode<synchronous>, transform_indices = @transform_4, window_bounds = array<i64: 128, 128>}, {pipeline_mode = #tpu.pipeline_mode<synchronous>, transform_indices = @transform_5, window_bounds = array<i64: 1, 128>}, {pipeline_mode = #tpu.pipeline_mode<synchronous>, transform_indices = @transform_6, window_bounds = array<i64: 128, 256>}, {pipeline_mode = #tpu.pipeline_mode<synchronous>, transform_indices = @transform_7, window_bounds = array<i64: 1, 256>}, {pipeline_mode = #tpu.pipeline_mode<synchronous>, transform_indices = @transform_8, window_bounds = array<i64: 128, 128>}, {pipeline_mode = #tpu.pipeline_mode<synchronous>, transform_indices = @transform_9, window_bounds = array<i64: 1, 128>}, {pipeline_mode = #tpu.pipeline_mode<synchronous>, transform_indices = @transform_10, window_bounds = array<i64: 128, 128>}, {pipeline_mode = #tpu.pipeline_mode<synchronous>, transform_indices = @transform_11, window_bounds = array<i64: 1, 128>}, {pipeline_mode = #tpu.pipeline_mode<synchronous>, transform_indices = @transform_12, window_bounds = array<i64: 128, 128>}, {pipeline_mode = #tpu.pipeline_mode<synchronous>, transform_indices = @transform_13, window_bounds = array<i64: 1, 128>}, {transform_indices = @transform_14, window_bounds = array<i64: 8, 128>}, {transform_indices = @transform_15, window_bounds = array<i64: 8, 128>}, {transform_indices = @transform_16, window_bounds = array<i64: 8, 128>}]} {
    %c0 = arith.constant 0 : index
    %c0_0 = arith.constant 0 : index
    %0 = vector.load %arg1[%c0, %c0_0] : memref<8x128xf32, #tpu.memory_space<vmem>>, vector<8x128xf32>
    %1 = arith.truncf %0 : vector<8x128xf32> to vector<8x128xbf16>
    %c0_1 = arith.constant 0 : index
    %c0_2 = arith.constant 0 : index
    %2 = vector.load %arg3[%c0_1, %c0_2] : memref<128x128xbf16, #tpu.memory_space<vmem>>, vector<128x128xbf16>
    %cst = arith.constant dense<0.000000e+00> : vector<8x128xf32>
    %3 = tpu.matmul %1, %2, %cst {dimension_numbers = #tpu.dot_dimension_numbers<[1], [0], [0], [1], [0, 0, 1, 1], [], []>} : vector<8x128xbf16>, vector<128x128xbf16>, vector<8x128xf32> -> vector<8x128xf32>
    %c0_3 = arith.constant 0 : index
    %c0_4 = arith.constant 0 : index
    %4 = vector.load %arg4[%c0_3, %c0_4] : memref<1x128xf32, #tpu.memory_space<vmem>>, vector<1x128xf32>
    %5 = vector.broadcast %4 : vector<1x128xf32> to vector<8x128xf32>
    %6 = arith.addf %3, %5 : vector<8x128xf32>
    %cst_5 = arith.constant 0.000000e+00 : f32
    %7 = vector.broadcast %cst_5 : f32 to vector<8x128xf32>
    %8 = arith.cmpf oge, %6, %7 : vector<8x128xf32>
    %cst_6 = arith.constant 0.00999999977 : f32
    %9 = vector.broadcast %cst_6 : f32 to vector<8x128xf32>
    %10 = arith.mulf %9, %6 : vector<8x128xf32>
    %11 = arith.select %8, %6, %10 : vector<8x128xi1>, vector<8x128xf32>
    %12 = arith.truncf %11 : vector<8x128xf32> to vector<8x128xbf16>
    %c0_7 = arith.constant 0 : index
    %c0_8 = arith.constant 0 : index
    %13 = vector.load %arg5[%c0_7, %c0_8] : memref<128x128xbf16, #tpu.memory_space<vmem>>, vector<128x128xbf16>
    %cst_9 = arith.constant dense<0.000000e+00> : vector<8x128xf32>
    %14 = tpu.matmul %12, %13, %cst_9 {dimension_numbers = #tpu.dot_dimension_numbers<[1], [0], [0], [1], [0, 0, 1, 1], [], []>} : vector<8x128xbf16>, vector<128x128xbf16>, vector<8x128xf32> -> vector<8x128xf32>
    %c0_10 = arith.constant 0 : index
    %c0_11 = arith.constant 0 : index
    %15 = vector.load %arg6[%c0_10, %c0_11] : memref<1x128xf32, #tpu.memory_space<vmem>>, vector<1x128xf32>
    %16 = vector.broadcast %15 : vector<1x128xf32> to vector<8x128xf32>
    %17 = arith.addf %14, %16 : vector<8x128xf32>
    %cst_12 = arith.constant 0.000000e+00 : f32
    %18 = vector.broadcast %cst_12 : f32 to vector<8x128xf32>
    %19 = arith.cmpf oge, %17, %18 : vector<8x128xf32>
    %cst_13 = arith.constant 0.00999999977 : f32
    %20 = vector.broadcast %cst_13 : f32 to vector<8x128xf32>
    %21 = arith.mulf %20, %17 : vector<8x128xf32>
    %22 = arith.select %19, %17, %21 : vector<8x128xi1>, vector<8x128xf32>
    %23 = arith.truncf %22 : vector<8x128xf32> to vector<8x128xbf16>
    %c0_14 = arith.constant 0 : index
    %c0_15 = arith.constant 0 : index
    %24 = vector.load %arg7[%c0_14, %c0_15] : memref<128x256xbf16, #tpu.memory_space<vmem>>, vector<128x256xbf16>
    %cst_16 = arith.constant dense<0.000000e+00> : vector<8x256xf32>
    %25 = tpu.matmul %23, %24, %cst_16 {dimension_numbers = #tpu.dot_dimension_numbers<[1], [0], [0], [1], [0, 0, 1, 1], [], []>} : vector<8x128xbf16>, vector<128x256xbf16>, vector<8x256xf32> -> vector<8x256xf32>
    %c0_17 = arith.constant 0 : index
    %c0_18 = arith.constant 0 : index
    %26 = vector.load %arg8[%c0_17, %c0_18] : memref<1x256xf32, #tpu.memory_space<vmem>>, vector<1x256xf32>
    %27 = vector.broadcast %26 : vector<1x256xf32> to vector<8x256xf32>
    %28 = arith.addf %25, %27 : vector<8x256xf32>
    %29 = vector.extract_strided_slice %28 {offsets = [0, 0], sizes = [8, 128], strides = [1, 1]} : vector<8x256xf32> to vector<8x128xf32>
    %30 = vector.extract_strided_slice %28 {offsets = [0, 128], sizes = [8, 128], strides = [1, 1]} : vector<8x256xf32> to vector<8x128xf32>
    %c0_19 = arith.constant 0 : index
    %c0_20 = arith.constant 0 : index
    %31 = vector.load %arg16[%c0_19, %c0_20] : memref<8x128xf32, #tpu.memory_space<vmem>>, vector<8x128xf32>
    tpu.vector_store %arg16[%c0_19, %c0_20], %29 {strides = array<i32>} : memref<8x128xf32, #tpu.memory_space<vmem>>, vector<8x128xf32>,
    %c0_21 = arith.constant 0 : index
    %c0_22 = arith.constant 0 : index
    %32 = vector.load %arg17[%c0_21, %c0_22] : memref<8x128xf32, #tpu.memory_space<vmem>>, vector<8x128xf32>
    tpu.vector_store %arg17[%c0_21, %c0_22], %30 {strides = array<i32>} : memref<8x128xf32, #tpu.memory_space<vmem>>, vector<8x128xf32>,
    %cst_23 = arith.constant 5.000000e-01 : f32
    %33 = vector.broadcast %cst_23 : f32 to vector<8x128xf32>
    %34 = arith.mulf %33, %30 : vector<8x128xf32>
    %35 = math.exp %34 : vector<8x128xf32>
    %c0_24 = arith.constant 0 : index
    %c0_25 = arith.constant 0 : index
    %36 = vector.load %arg2[%c0_24, %c0_25] : memref<8x128xf32, #tpu.memory_space<vmem>>, vector<8x128xf32>
    %37 = arith.mulf %36, %35 : vector<8x128xf32>
    %38 = arith.addf %29, %37 : vector<8x128xf32>
    %39 = arith.truncf %38 : vector<8x128xf32> to vector<8x128xbf16>
    %c0_26 = arith.constant 0 : index
    %c0_27 = arith.constant 0 : index
    %40 = vector.load %arg9[%c0_26, %c0_27] : memref<128x128xbf16, #tpu.memory_space<vmem>>, vector<128x128xbf16>
    %cst_28 = arith.constant dense<0.000000e+00> : vector<8x128xf32>
    %41 = tpu.matmul %39, %40, %cst_28 {dimension_numbers = #tpu.dot_dimension_numbers<[1], [0], [0], [1], [0, 0, 1, 1], [], []>} : vector<8x128xbf16>, vector<128x128xbf16>, vector<8x128xf32> -> vector<8x128xf32>
    %c0_29 = arith.constant 0 : index
    %c0_30 = arith.constant 0 : index
    %42 = vector.load %arg10[%c0_29, %c0_30] : memref<1x128xf32, #tpu.memory_space<vmem>>, vector<1x128xf32>
    %43 = vector.broadcast %42 : vector<1x128xf32> to vector<8x128xf32>
    %44 = arith.addf %41, %43 : vector<8x128xf32>
    %cst_31 = arith.constant 0.000000e+00 : f32
    %45 = vector.broadcast %cst_31 : f32 to vector<8x128xf32>
    %46 = arith.cmpf oge, %44, %45 : vector<8x128xf32>
    %cst_32 = arith.constant 0.00999999977 : f32
    %47 = vector.broadcast %cst_32 : f32 to vector<8x128xf32>
    %48 = arith.mulf %47, %44 : vector<8x128xf32>
    %49 = arith.select %46, %44, %48 : vector<8x128xi1>, vector<8x128xf32>
    %50 = arith.truncf %49 : vector<8x128xf32> to vector<8x128xbf16>
    %c0_33 = arith.constant 0 : index
    %c0_34 = arith.constant 0 : index
    %51 = vector.load %arg11[%c0_33, %c0_34] : memref<128x128xbf16, #tpu.memory_space<vmem>>, vector<128x128xbf16>
    %cst_35 = arith.constant dense<0.000000e+00> : vector<8x128xf32>
    %52 = tpu.matmul %50, %51, %cst_35 {dimension_numbers = #tpu.dot_dimension_numbers<[1], [0], [0], [1], [0, 0, 1, 1], [], []>} : vector<8x128xbf16>, vector<128x128xbf16>, vector<8x128xf32> -> vector<8x128xf32>
    %c0_36 = arith.constant 0 : index
    %c0_37 = arith.constant 0 : index
    %53 = vector.load %arg12[%c0_36, %c0_37] : memref<1x128xf32, #tpu.memory_space<vmem>>, vector<1x128xf32>
    %54 = vector.broadcast %53 : vector<1x128xf32> to vector<8x128xf32>
    %55 = arith.addf %52, %54 : vector<8x128xf32>
    %cst_38 = arith.constant 0.000000e+00 : f32
    %56 = vector.broadcast %cst_38 : f32 to vector<8x128xf32>
    %57 = arith.cmpf oge, %55, %56 : vector<8x128xf32>
    %cst_39 = arith.constant 0.00999999977 : f32
    %58 = vector.broadcast %cst_39 : f32 to vector<8x128xf32>
    %59 = arith.mulf %58, %55 : vector<8x128xf32>
    %60 = arith.select %57, %55, %59 : vector<8x128xi1>, vector<8x128xf32>
    %61 = arith.truncf %60 : vector<8x128xf32> to vector<8x128xbf16>
    %c0_40 = arith.constant 0 : index
    %c0_41 = arith.constant 0 : index
    %62 = vector.load %arg13[%c0_40, %c0_41] : memref<128x128xbf16, #tpu.memory_space<vmem>>, vector<128x128xbf16>
    %cst_42 = arith.constant dense<0.000000e+00> : vector<8x128xf32>
    %63 = tpu.matmul %61, %62, %cst_42 {dimension_numbers = #tpu.dot_dimension_numbers<[1], [0], [0], [1], [0, 0, 1, 1], [], []>} : vector<8x128xbf16>, vector<128x128xbf16>, vector<8x128xf32> -> vector<8x128xf32>
    %c0_43 = arith.constant 0 : index
    %c0_44 = arith.constant 0 : index
    %64 = vector.load %arg14[%c0_43, %c0_44] : memref<1x128xf32, #tpu.memory_space<vmem>>, vector<1x128xf32>
    %65 = vector.broadcast %64 : vector<1x128xf32> to vector<8x128xf32>
    %66 = arith.addf %63, %65 : vector<8x128xf32>
    %c0_45 = arith.constant 0 : index
    %c0_46 = arith.constant 0 : index
    %67 = vector.load %arg15[%c0_45, %c0_46] : memref<8x128xf32, #tpu.memory_space<vmem>>, vector<8x128xf32>
    tpu.vector_store %arg15[%c0_45, %c0_46], %66 {strides = array<i32>} : memref<8x128xf32, #tpu.memory_space<vmem>>, vector<8x128xf32>,
    return
  }
  func.func @transform_0(%arg0: i32) -> (i32, i32) {
    %c0_i32 = arith.constant 0 : i32
    %c0_i32_0 = arith.constant 0 : i32
    return %arg0, %c0_i32 : i32, i32
  }
  func.func @transform_1(%arg0: i32) -> (i32, i32) {
    %c0_i32 = arith.constant 0 : i32
    %c0_i32_0 = arith.constant 0 : i32
    return %arg0, %c0_i32 : i32, i32
  }
  func.func @transform_2(%arg0: i32) -> (i32, i32) {
    %c0_i32 = arith.constant 0 : i32
    %c0_i32_0 = arith.constant 0 : i32
    %c0_i32_1 = arith.constant 0 : i32
    return %c0_i32, %c0_i32_0 : i32, i32
  }
  func.func @transform_3(%arg0: i32) -> (i32, i32) {
    %c0_i32 = arith.constant 0 : i32
    %c0_i32_0 = arith.constant 0 : i32
    %c0_i32_1 = arith.constant 0 : i32
    return %c0_i32, %c0_i32_0 : i32, i32
  }
  func.func @transform_4(%arg0: i32) -> (i32, i32) {
    %c0_i32 = arith.constant 0 : i32
    %c0_i32_0 = arith.constant 0 : i32
    %c0_i32_1 = arith.constant 0 : i32
    return %c0_i32, %c0_i32_0 : i32, i32
  }
  func.func @transform_5(%arg0: i32) -> (i32, i32) {
    %c0_i32 = arith.constant 0 : i32
    %c0_i32_0 = arith.constant 0 : i32
    %c0_i32_1 = arith.constant 0 : i32
    return %c0_i32, %c0_i32_0 : i32, i32
  }
  func.func @transform_6(%arg0: i32) -> (i32, i32) {
    %c0_i32 = arith.constant 0 : i32
    %c0_i32_0 = arith.constant 0 : i32
    %c0_i32_1 = arith.constant 0 : i32
    return %c0_i32, %c0_i32_0 : i32, i32
  }
  func.func @transform_7(%arg0: i32) -> (i32, i32) {
    %c0_i32 = arith.constant 0 : i32
    %c0_i32_0 = arith.constant 0 : i32
    %c0_i32_1 = arith.constant 0 : i32
    return %c0_i32, %c0_i32_0 : i32, i32
  }
  func.func @transform_8(%arg0: i32) -> (i32, i32) {
    %c0_i32 = arith.constant 0 : i32
    %c0_i32_0 = arith.constant 0 : i32
    %c0_i32_1 = arith.constant 0 : i32
    return %c0_i32, %c0_i32_0 : i32, i32
  }
  func.func @transform_9(%arg0: i32) -> (i32, i32) {
    %c0_i32 = arith.constant 0 : i32
    %c0_i32_0 = arith.constant 0 : i32
    %c0_i32_1 = arith.constant 0 : i32
    return %c0_i32, %c0_i32_0 : i32, i32
  }
  func.func @transform_10(%arg0: i32) -> (i32, i32) {
    %c0_i32 = arith.constant 0 : i32
    %c0_i32_0 = arith.constant 0 : i32
    %c0_i32_1 = arith.constant 0 : i32
    return %c0_i32, %c0_i32_0 : i32, i32
  }
  func.func @transform_11(%arg0: i32) -> (i32, i32) {
    %c0_i32 = arith.constant 0 : i32
    %c0_i32_0 = arith.constant 0 : i32
    %c0_i32_1 = arith.constant 0 : i32
    return %c0_i32, %c0_i32_0 : i32, i32
  }
  func.func @transform_12(%arg0: i32) -> (i32, i32) {
    %c0_i32 = arith.constant 0 : i32
    %c0_i32_0 = arith.constant 0 : i32
    %c0_i32_1 = arith.constant 0 : i32
    return %c0_i32, %c0_i32_0 : i32, i32
  }
  func.func @transform_13(%arg0: i32) -> (i32, i32) {
    %c0_i32 = arith.constant 0 : i32
    %c0_i32_0 = arith.constant 0 : i32
    %c0_i32_1 = arith.constant 0 : i32
    return %c0_i32, %c0_i32_0 : i32, i32
  }
  func.func @transform_14(%arg0: i32) -> (i32, i32) {
    %c0_i32 = arith.constant 0 : i32
    %c0_i32_0 = arith.constant 0 : i32
    return %arg0, %c0_i32 : i32, i32
  }
  func.func @transform_15(%arg0: i32) -> (i32, i32) {
    %c0_i32 = arith.constant 0 : i32
    %c0_i32_0 = arith.constant 0 : i32
    return %arg0, %c0_i32 : i32, i32
  }
  func.func @transform_16(%arg0: i32) -> (i32, i32) {
    %c0_i32 = arith.constant 0 : i32
    %c0_i32_0 = arith.constant 0 : i32
    return %arg0, %c0_i32 : i32, i32
  }
}

</mosaic_0001>

<bundles_post_ra>
// kernel: vae_forward.1
= control target key start
LH: loop header
LB: loop body
LE: loop exit
PB: predicated region body
PF: predicated region fallthrough
CT: control target
= control target key end

     0   :  { %s1630_s0 = inlined_call_operand.vmem [shape: f32[8,128], index: 0, kind: input, shape index: {}]   ;;  %s1631_s1 = inlined_call_operand.vmem [shape: f32[8,128], index: 1, kind: input, shape index: {}]   ;;  %s1632_s2 = inlined_call_operand.vmem [shape: bf16[128,128], index: 2, kind: input, shape index: {}]   ;;  %s1633_s3 = inlined_call_operand.vmem [shape: f32[1,128], index: 3, kind: input, shape index: {}]   ;;  %s1634_s4 = inlined_call_operand.hbm [shape: bf16[128,128], index: 4, kind: input, shape index: {}]   ;;  %s1635_s5 = inlined_call_operand.hbm [shape: f32[1,128], index: 5, kind: input, shape index: {}]   ;;  %s1636_s6 = inlined_call_operand.hbm [shape: bf16[128,256], index: 6, kind: input, shape index: {}]   ;;  %s1637_s7 = inlined_call_operand.hbm [shape: f32[1,256], index: 7, kind: input, shape index: {}]   ;;  %s1638_s8 = inlined_call_operand.hbm [shape: bf16[128,128], index: 8, kind: input, shape index: {}]   ;;  %s1639_s9 = inlined_call_operand.hbm [shape: f32[1,128], index: 9, kind: input, shape index: {}]   ;;  %s1640_s10 = inlined_call_operand.hbm [shape: bf16[128,128], index: 10, kind: input, shape index: {}]   ;;  %s1641_s11 = inlined_call_operand.hbm [shape: f32[1,128], index: 11, kind: input, shape index: {}]   ;;  %s1642_s12 = inlined_call_operand.hbm [shape: bf16[128,128], index: 12, kind: input, shape index: {}]   ;;  %s1643_s13 = inlined_call_operand.hbm [shape: f32[1,128], index: 13, kind: input, shape index: {}]   ;;  %s1644_s14 = inlined_call_operand.hbm [shape: f32[8,128], index: 14, kind: output, shape index: {0}]   ;;  %s1645_s15 = inlined_call_operand.hbm [shape: f32[8,128], index: 15, kind: output, shape index: {1}]   ;;  %s1646_s16 = inlined_call_operand.hbm [shape: f32[8,128], index: 16, kind: output, shape index: {2}]  }
   0x1   :  { %1647 = sst [smem:[#allocation31_spill]] %s1630_s0 }
   0x2   :  { %22 = vsyncpa [#allocation3], 0 }
   0x3   :  { %23 = vsyncpa [#allocation6], 0 }
   0x4   :  { %24 = vsyncpa [#allocation9], 0 }
   0x5   :  { %25 = vsyncpa [#allocation12], 0 }
   0x6   :  { %26 = vsyncpa [#allocation15], 0 }
   0x7   :  { %27 = vsyncpa [#allocation18], 0 }
   0x8   :  { %28 = vsyncpa [#allocation4], 0  ;;  %s56_s23 = sshll.u32 %s1635_s5, 4  ;;  %s57_s23 = int_to_ptr.hbm [resolvable:$true] %s56_s23 }
   0x9   :  { %29 = vsyncpa [#allocation21], 0  ;;  %s1444_s24 = smov [#allocation5]   ;;  %s80_s28 = sshll.u32 %s1637_s7, 4  ;;  %s81_s28 = int_to_ptr.hbm [resolvable:$true] %s80_s28 }
   0xa   :  { %s58_s25 = sshll.u32 %s1444_s24, 4  ;;  %s1445_s29 = smov [#allocation8]   ;;  %s59_s25 = int_to_ptr.vmem [resolvable:$true] %s58_s25 }
   0xb   :  { %61 = dma.hbm_to_vmem [thread:$0]  %s57_s23, 16, %s59_s25, [#allocation6]  }
   0xc   :  { %s82_s30 = sshll.u32 %s1445_s29, 4  ;;  %s104_s18 = sshll.u32 %s1639_s9, 4  ;;  %s83_s30 = int_to_ptr.vmem [resolvable:$true] %s82_s30  ;;  %s105_s18 = int_to_ptr.hbm [resolvable:$true] %s104_s18 }
   0xd   :  { %85 = dma.hbm_to_vmem [thread:$0]  %s81_s28, 32, %s83_s30, [#allocation9]  }
   0xe   :  { %s128_s20 = sshll.u32 %s1641_s11, 4  ;;  %s1446_s21 = smov [#allocation11]   ;;  %s129_s20 = int_to_ptr.hbm [resolvable:$true] %s128_s20 }
   0xf   :  { %s106_s22 = sshll.u32 %s1446_s21, 4  ;;  %s1447_s7 = smov [#allocation14]   ;;  %s107_s22 = int_to_ptr.vmem [resolvable:$true] %s106_s22 }
  0x10   :  { %109 = dma.hbm_to_vmem [thread:$0]  %s105_s18, 16, %s107_s22, [#allocation12]  }
  0x11   :  { %s130_s23 = sshll.u32 %s1447_s7, 4  ;;  %s42_s26 = sshll.u32 %s1634_s4, 4  ;;  %s131_s23 = int_to_ptr.vmem [resolvable:$true] %s130_s23  ;;  %s43_s26 = int_to_ptr.hbm [resolvable:$true] %s42_s26 }
  0x12   :  { %133 = dma.hbm_to_vmem [thread:$0]  %s129_s20, 16, %s131_s23, [#allocation15]  }
  0x13   :  { %s1448_s9 = smov [#allocation2]   ;;  %s66_s11 = sshll.u32 %s1636_s6, 4  ;;  %s67_s11 = int_to_ptr.hbm [resolvable:$true] %s66_s11 }
  0x14   :  { %s44_s27 = sshll.u32 %s1448_s9, 4  ;;  %s1449_s30 = smov 64   ;;  %s45_s27 = int_to_ptr.vmem [resolvable:$true] %s44_s27 }
  0x15   :  { %s1450_s0 = smov 4   ;;  %s1451_s17 = smov [#allocation7]  }
  0x16   :  { %50 = dma.hbm_to_vmem [thread:$0]  %s43_s26, 1024, %s45_s27, [#allocation3], %s1449_s30, %s1449_s30, %s1450_s0  }
  0x17   :  { %s68_s18 = sshll.u32 %s1451_s17, 4  ;;  %s1452_s4 = smov 128   ;;  %s69_s18 = int_to_ptr.vmem [resolvable:$true] %s68_s18 }
  0x18   :  { %s1453_s5 = smov 8   ;;  %s90_s21 = sshll.u32 %s1638_s8, 4  ;;  %s91_s21 = int_to_ptr.hbm [resolvable:$true] %s90_s21 }
  0x19   :  { %74 = dma.hbm_to_vmem [thread:$0]  %s67_s11, 2048, %s69_s18, [#allocation6], %s1452_s4, %s1452_s4, %s1453_s5  }
  0x1a   :  { %s1454_s22 = smov [#allocation10]   ;;  %s114_s24 = sshll.u32 %s1640_s10, 4  ;;  %s115_s24 = int_to_ptr.hbm [resolvable:$true] %s114_s24 }
  0x1b   :  { %s92_s6 = sshll.u32 %s1454_s22, 4  ;;  %s1455_s25 = smov [#allocation13]   ;;  %s93_s6 = int_to_ptr.vmem [resolvable:$true] %s92_s6 }
  0x1c   :  { %98 = dma.hbm_to_vmem [thread:$0]  %s91_s21, 1024, %s93_s6, [#allocation9], %s1449_s30, %s1449_s30, %s1450_s0  }
  0x1d   :  { %s116_s26 = sshll.u32 %s1455_s25, 4  ;;  %s138_s28 = sshll.u32 %s1642_s12, 4  ;;  %s117_s26 = int_to_ptr.vmem [resolvable:$true] %s116_s26  ;;  %s139_s28 = int_to_ptr.hbm [resolvable:$true] %s138_s28 }
  0x1e   :  { %122 = dma.hbm_to_vmem [thread:$0]  %s115_s24, 1024, %s117_s26, [#allocation12], %s1449_s30, %s1449_s30, %s1450_s0  }
  0x1f   :  { %s152_s10 = sshll.u32 %s1643_s13, 4  ;;  %s1456_s11 = smov [#allocation16]   ;;  %s153_s10 = int_to_ptr.hbm [resolvable:$true] %s152_s10 }
  0x20   :  { %s140_s17 = sshll.u32 %s1456_s11, 4  ;;  %s1457_s18 = smov [#allocation17]   ;;  %s141_s17 = int_to_ptr.vmem [resolvable:$true] %s140_s17 }
  0x21   :  { %146 = dma.hbm_to_vmem [thread:$0]  %s139_s28, 1024, %s141_s17, [#allocation15], %s1449_s30, %s1449_s30, %s1450_s0  }
  0x22   :  { %s154_s12 = sshll.u32 %s1457_s18, 4  ;;  %s155_s12 = int_to_ptr.vmem [resolvable:$true] %s154_s12 }
  0x23   :  { %157 = dma.hbm_to_vmem [thread:$0]  %s153_s10, 16, %s155_s12, [#allocation18]  }
  0x24   :  { %1428 = dma.done.wait [#allocation3], 1024  }
  0x25   :  { %1429 = vsyncadd [#allocation3], 4294966272 }
  0x26   :  { %1430 = dma.done.wait [#allocation6], 2064  }
  0x27   :  { %1431 = vsyncadd [#allocation6], 4294965232 }
  0x28   :  { %1432 = dma.done.wait [#allocation9], 1056  }
  0x29   :  { %1433 = vsyncadd [#allocation9], 4294966240 }
  0x2a   :  { %1434 = dma.done.wait [#allocation12], 1040  }
  0x2b   :  { %1435 = vsyncadd [#allocation12], 4294966256 }
  0x2c   :  { %1436 = dma.done.wait [#allocation15], 1040  }
  0x2d   :  { %1437 = vsyncadd [#allocation15], 4294966256 }
  0x2e   :  { %1438 = dma.done.wait [#allocation18], 16  }
  0x2f   :  { %1439 = vsyncadd [#allocation18], 4294967280  ;;  %v1043_v0 = vld [vmem:[%s1632_s2 + $0x38] sm:$0xff]  ;;  %v1042_v1 = vld [vmem:[%s1632_s2 + $0x30] sm:$0xff]  ;;  %s1648_s8 = sld [smem:[#allocation31_spill]]  ;;  %s777_s17 = sshll.u32 %s1645_s15, 4  ;;  %s778_s17 = int_to_ptr.hbm [resolvable:$true] %s777_s17 }
  0x30   :  { %268 = vmatpush.bf16.msra.mxu0 %v1043_v0  ;;  %v1051_v2 = vld [vmem:[#allocation2 + $0x38] sm:$0xff]  ;;  %v1041_v3 = vld [vmem:[%s1632_s2 + $0x28] sm:$0xff]  ;;  %v1050_v4 = vld [vmem:[#allocation2 + $0x30] sm:$0xff]  ;;  %s1458_s18 = smov [#allocation20]   ;;  %s1459_s13 = smov [#allocation22]  }
  0x31   :  { %353 = vmatpush.bf16.msra.mxu1 %v1051_v2  ;;  %v1049_v5 = vld [vmem:[#allocation2 + $0x28] sm:$0xff]  ;;  %v1040_v6 = vld [vmem:[%s1632_s2 + $0x20] sm:$0xff]  ;;  %v1039_v8 = vld [vmem:[%s1632_s2 + $0x18] sm:$0xff]  ;;  %s775_s12 = sshll.u32 %s1458_s18, 4  ;;  %s786_s4 = sshll.u32 %s1459_s13, 4  ;;  %s776_s12 = int_to_ptr.vmem [resolvable:$true] %s775_s12  ;;  %s787_s4 = int_to_ptr.vmem [resolvable:$true] %s786_s4 }
  0x32   :  { %v1048_v7 = vld [vmem:[#allocation2 + $0x20] sm:$0xff]  ;;  %v1047_v9 = vld [vmem:[#allocation2 + $0x18] sm:$0xff]  ;;  %v1038_v10 = vld [vmem:[%s1632_s2 + $0x10] sm:$0xff]  ;;  %s788_s5 = sshll.u32 %s1646_s16, 4  ;;  %s1460_s19 = smov [#allocation19]   ;;  %s789_s5 = int_to_ptr.hbm [resolvable:$true] %s788_s5 }
  0x33   :  { %v1046_v11 = vld [vmem:[#allocation2 + $0x10] sm:$0xff]  ;;  %v1037_v12 = vld [vmem:[%s1632_s2 + $0x8] sm:$0xff]  ;;  %v1036_v13 = vld [vmem:[%s1632_s2] sm:$0xff]  ;;  %s764_s20 = sshll.u32 %s1460_s19, 4  ;;  %s766_s15 = sshll.u32 %s1644_s14, 4  ;;  %s765_s20 = int_to_ptr.vmem [resolvable:$true] %s764_s20  ;;  %s767_s15 = int_to_ptr.hbm [resolvable:$true] %s766_s15 }
  0x34   :  { %269 = vmatpush.bf16.msra.mxu0 %v1042_v1  ;;  %v1045_v16 = vld [vmem:[#allocation2 + $0x8] sm:$0xff]  ;;  %v1044_v17 = vld [vmem:[#allocation2] sm:$0xff]  ;;  %v934_v18 = vld [vmem:[#allocation7 + $0x70] sm:$0xf] }
  0x35   :  { %354 = vmatpush.bf16.msra.mxu1 %v1050_v4  ;;  %v198_v14 = vld [vmem:[%s1648_s8] sm:$0xff]  ;;  %v1067_v19 = vld [vmem:[#allocation7 + $0x74] sm:$0xf0]  ;;  %v1066_v20 = vld [vmem:[#allocation7 + $0x74] sm:$0xf] }
  0x36   :  { %v199_v15 = vpack.c.bf16 %v198_v14, %v198_v14  ;;  %v935_v21 = vor.u32 %v1067_v19, %v934_v18  ;;  %v936_v22 = vld [vmem:[#allocation7 + $0x78] sm:$0xf0]  ;;  %v926_v23 = vld [vmem:[#allocation7 + $0x60] sm:$0xf]  ;;  %v1065_v24 = vld [vmem:[#allocation7 + $0x64] sm:$0xf0] }
  0x37   :  { %v939_v25 = vor.u32 %v1066_v20, %v936_v22  ;;  %v1064_v26 = vld [vmem:[#allocation7 + $0x64] sm:$0xf]  ;;  %v928_v27 = vld [vmem:[#allocation7 + $0x68] sm:$0xf0]  ;;  %v927_v28 = vor.u32 %v1065_v24, %v926_v23  ;;  %v918_v30 = vld [vmem:[#allocation7 + $0x50] sm:$0xf] }
  0x38   :  { %270 = vmatpush.bf16.msra.mxu0 %v1041_v3  ;;  %472 = vmatpush.bf16.msra.mxu2 %v935_v21  ;;  %v931_v29 = vor.u32 %v1064_v26, %v928_v27  ;;  %v1063_v31 = vld [vmem:[#allocation7 + $0x54] sm:$0xf0]  ;;  %v1062_v32 = vld [vmem:[#allocation7 + $0x54] sm:$0xf]  ;;  %v920_v33 = vld [vmem:[#allocation7 + $0x58] sm:$0xf0] }
  0x39   :  { %355 = vmatpush.bf16.msra.mxu1 %v1049_v5  ;;  %485 = vmatpush.bf16.msra.mxu3 %v939_v25  ;;  %v919_v34 = vor.u32 %v1063_v31, %v918_v30  ;;  %v923_v35 = vor.u32 %v1062_v32, %v920_v33  ;;  %v910_v36 = vld [vmem:[#allocation7 + $0x40] sm:$0xf]  ;;  %v1061_v37 = vld [vmem:[#allocation7 + $0x44] sm:$0xf0]  ;;  %v1060_v38 = vld [vmem:[#allocation7 + $0x44] sm:$0xf] }
  0x3a   :  { %v912_v39 = vld [vmem:[#allocation7 + $0x48] sm:$0xf0]  ;;  %v911_v40 = vor.u32 %v1061_v37, %v910_v36  ;;  %v902_v42 = vld [vmem:[#allocation7 + $0x30] sm:$0xf]  ;;  %v1059_v43 = vld [vmem:[#allocation7 + $0x34] sm:$0xf0] }
  0x3b   :  { %v915_v41 = vor.u32 %v1060_v38, %v912_v39  ;;  %v1058_v44 = vld [vmem:[#allocation7 + $0x34] sm:$0xf]  ;;  %v904_v45 = vld [vmem:[#allocation7 + $0x38] sm:$0xf0]  ;;  %v903_v46 = vor.u32 %v1059_v43, %v902_v42  ;;  %v894_v48 = vld [vmem:[#allocation7 + $0x20] sm:$0xf] }
  0x3c   :  { %271 = vmatpush.bf16.msra.mxu0 %v1040_v6  ;;  %473 = vmatpush.bf16.msra.mxu2 %v927_v28  ;;  %v907_v47 = vor.u32 %v1058_v44, %v904_v45  ;;  %v1057_v49 = vld [vmem:[#allocation7 + $0x24] sm:$0xf0]  ;;  %v1056_v50 = vld [vmem:[#allocation7 + $0x24] sm:$0xf]  ;;  %v896_v51 = vld [vmem:[#allocation7 + $0x28] sm:$0xf0] }
  0x3d   :  { %356 = vmatpush.bf16.msra.mxu1 %v1048_v7  ;;  %486 = vmatpush.bf16.msra.mxu3 %v931_v29  ;;  %v895_v52 = vor.u32 %v1057_v49, %v894_v48  ;;  %v899_v53 = vor.u32 %v1056_v50, %v896_v51  ;;  %v1109_v54 = vld [vmem:[%s1633_s3] ss:$0 sm:$0xff]  ;;  %v886_v61 = vld [vmem:[#allocation7 + $0x10] sm:$0xf]  ;;  %v1055_v62 = vld [vmem:[#allocation7 + $0x14] sm:$0xf0] }
  0x3e   :  { %v1054_v63 = vld [vmem:[#allocation7 + $0x14] sm:$0xf]  ;;  %v887_v0 = vor.u32 %v1055_v62, %v886_v61  ;;  %v888_v1 = vld [vmem:[#allocation7 + $0x18] sm:$0xf0]  ;;  %v878_v3 = vld [vmem:[#allocation7] sm:$0xf] }
  0x3f   :  { %v891_v2 = vor.u32 %v1054_v63, %v888_v1  ;;  %v1053_v4 = vld [vmem:[#allocation7 + $0x4] sm:$0xf0]  ;;  %v1052_v5 = vld [vmem:[#allocation7 + $0x4] sm:$0xf]  ;;  %v880_v7 = vld [vmem:[#allocation7 + $0x8] sm:$0xf0] }
  0x40   :  { %272 = vmatpush.bf16.msra.mxu0 %v1039_v8  ;;  %474 = vmatpush.bf16.msra.mxu2 %v919_v34  ;;  %v879_v6 = vor.u32 %v1053_v4, %v878_v3  ;;  %v883_v8 = vor.u32 %v1052_v5, %v880_v7  ;;  %v1072_v19 = vld [vmem:[#allocation10 + $0x20] sm:$0xff]  ;;  %v1071_v20 = vld [vmem:[#allocation10 + $0x18] sm:$0xff]  ;;  %v1070_v21 = vld [vmem:[#allocation10 + $0x10] sm:$0xff] }
  0x41   :  { %357 = vmatpush.bf16.msra.mxu1 %v1047_v9  ;;  %487 = vmatpush.bf16.msra.mxu3 %v923_v35  ;;  %v1075_v9 = vld [vmem:[#allocation10 + $0x38] sm:$0xff]  ;;  %v1069_v22 = vld [vmem:[#allocation10 + $0x8] sm:$0xff]  ;;  %v1068_v23 = vld [vmem:[#allocation10] sm:$0xff] }
  0x42   :  { %v1083_v24 = vld [vmem:[#allocation13 + $0x38] sm:$0xff]  ;;  %v1082_v25 = vld [vmem:[#allocation13 + $0x30] sm:$0xff]  ;;  %v1081_v27 = vld [vmem:[#allocation13 + $0x28] sm:$0xff] }
  0x43   :  { %v386_v26 = vld [vmem:[#allocation8] sm:$0x3]  ;;  %v1080_v30 = vld [vmem:[#allocation13 + $0x20] sm:$0xff]  ;;  %v1078_v38 = vld [vmem:[#allocation13 + $0x10] sm:$0xff] }
  0x44   :  { %273 = vmatpush.bf16.msra.mxu0 %v1038_v10  ;;  %475 = vmatpush.bf16.msra.mxu2 %v911_v40  ;;  %v1074_v10 = vld [vmem:[#allocation10 + $0x30] sm:$0xff]  ;;  %v388_v28 = vperm.slane %v386_v26, 0  ;;  %v389_v29 = vperm.slane %v386_v26, 1  ;;  %v1079_v35 = vld [vmem:[#allocation13 + $0x18] sm:$0xff]  ;;  %v1088_v51 = vld [vmem:[#allocation16 + $0x20] sm:$0xff] }
  0x45   :  { %358 = vmatpush.bf16.msra.mxu1 %v1046_v11  ;;  %488 = vmatpush.bf16.msra.mxu3 %v915_v41  ;;  %v1073_v11 = vld [vmem:[#allocation10 + $0x28] sm:$0xff]  ;;  %v503_v41 = vld [vmem:[%s1631_s1] sm:$0xff]  ;;  %v1090_v49 = vld [vmem:[#allocation16 + $0x30] sm:$0xff] }
  0x46   :  { %v1091_v48 = vld [vmem:[#allocation16 + $0x38] sm:$0xff]  ;;  %v1089_v50 = vld [vmem:[#allocation16 + $0x28] sm:$0xff]  ;;  %v1084_v62 = vld [vmem:[#allocation16] sm:$0xff] }
  0x47   :  { %v1085_v61 = vld [vmem:[#allocation16 + $0x8] sm:$0xff]  ;;  %v1112_v63 = vld [vmem:[#allocation14] ss:$0 sm:$0xff] }
  0x48   :  { %274 = vmatpush.bf16.msra.mxu0 %v1037_v12  ;;  %476 = vmatpush.bf16.msra.mxu2 %v903_v46  ;;  %v1110_v12 = vld [vmem:[#allocation5] ss:$0 sm:$0xff]  ;;  %v1077_v46 = vld [vmem:[#allocation13 + $0x8] sm:$0xff] }
  0x49   :  { %359 = vmatpush.bf16.msra.mxu1 %v1045_v16  ;;  %489 = vmatpush.bf16.msra.mxu3 %v907_v47  ;;  %v1076_v47 = vld [vmem:[#allocation13] sm:$0xff] }
  0x4c   :  { %275 = vmatpush.bf16.msra.mxu0 %v1036_v13  ;;  %477 = vmatpush.bf16.msra.mxu2 %v895_v52  ;;  %v1087_v52 = vld [vmem:[#allocation16 + $0x18] sm:$0xff] }
  0x4d   :  { %360 = vmatpush.bf16.msra.mxu1 %v1044_v17  ;;  %490 = vmatpush.bf16.msra.mxu3 %v899_v53  ;;  %v1086_v53 = vld [vmem:[#allocation16 + $0x10] sm:$0xff] }
  0x4f   :  { %276 = vmatmul.bf16.vlgmr.msra.gmra.mxu0 %v199_v15 }
  0x50   :  { %478 = vmatpush.bf16.msra.mxu2 %v887_v0  ;;  %575 = vmatpush.bf16.msrb.mxu0 %v1075_v9 }
  0x51   :  { %491 = vmatpush.bf16.msra.mxu3 %v891_v2  ;;  %660 = vmatpush.bf16.msrb.mxu1 %v1083_v24 }
  0x54   :  { %479 = vmatpush.bf16.msra.mxu2 %v879_v6  ;;  %576 = vmatpush.bf16.msrb.mxu0 %v1074_v10  ;;  %v1113_v6 = vld [vmem:[#allocation17] ss:$0 sm:$0xff] }
  0x55   :  { %492 = vmatpush.bf16.msra.mxu3 %v883_v8  ;;  %661 = vmatpush.bf16.msrb.mxu1 %v1082_v25 }
  0x58   :  { %577 = vmatpush.bf16.msrb.mxu0 %v1073_v11  ;;  %745 = vmatpush.bf16.msrb.mxu2 %v1091_v48 }
  0x59   :  { %662 = vmatpush.bf16.msrb.mxu1 %v1081_v27 }
  0x5c   :  { %578 = vmatpush.bf16.msrb.mxu0 %v1072_v19  ;;  %746 = vmatpush.bf16.msrb.mxu2 %v1090_v49 }
  0x5d   :  { %663 = vmatpush.bf16.msrb.mxu1 %v1080_v30 }
  0x60   :  { %579 = vmatpush.bf16.msrb.mxu0 %v1071_v20  ;;  %747 = vmatpush.bf16.msrb.mxu2 %v1089_v50 }
  0x61   :  { %664 = vmatpush.bf16.msrb.mxu1 %v1079_v35 }
  0x64   :  { %580 = vmatpush.bf16.msrb.mxu0 %v1070_v21  ;;  %748 = vmatpush.bf16.msrb.mxu2 %v1088_v51 }
  0x65   :  { %665 = vmatpush.bf16.msrb.mxu1 %v1078_v38 }
  0x68   :  { %581 = vmatpush.bf16.msrb.mxu0 %v1069_v22  ;;  %749 = vmatpush.bf16.msrb.mxu2 %v1087_v52 }
  0x69   :  { %666 = vmatpush.bf16.msrb.mxu1 %v1077_v46 }
  0x6c   :  { %582 = vmatpush.bf16.msrb.mxu0 %v1068_v23  ;;  %750 = vmatpush.bf16.msrb.mxu2 %v1086_v53 }
  0x6d   :  { %667 = vmatpush.bf16.msrb.mxu1 %v1076_v47 }
  0x70   :  { %751 = vmatpush.bf16.msrb.mxu2 %v1085_v61 }
  0x74   :  { %752 = vmatpush.bf16.msrb.mxu2 %v1084_v62 }
  0xcc   :  { %v277_v55 = vpop.f32.mrf.mxu0 }
  0xcd   :  { %v278_v56 = vadd.f32 %v1109_v54, %v277_v55  ;;  %v1111_v54 = vld [vmem:[#allocation11] ss:$0 sm:$0xff] }
  0xcf   :  { %v282_v57 = vmul.f32 0.01, %v278_v56  ;;  %vm281_vm0 = vcmp.ge.f32.partialorder %v278_v56, 0.0 }
  0xd1   :  { %v283_v58 = vsel %vm281_vm0, %v278_v56, %v282_v57 }
  0xd2   :  { %v284_v59 = vpack.c.bf16 %v283_v58, %v283_v58 }
  0xd4   :  { %v279_v60 = vpop.f32.mrf.mxu0  ;;  %361 = vmatmul.bf16.vlgmr.msra.gmra.mxu1 %v284_v59 }
 0x151   :  { %v362_v13 = vpop.f32.mrf.mxu1 }
 0x152   :  { %v363_v14 = vadd.f32 %v1110_v12, %v362_v13 }
 0x154   :  { %v367_v15 = vmul.f32 0.01, %v363_v14  ;;  %vm366_vm1 = vcmp.ge.f32.partialorder %v363_v14, 0.0 }
 0x156   :  { %v368_v16 = vsel %vm366_vm1, %v363_v14, %v367_v15 }
 0x157   :  { %v369_v17 = vpack.c.bf16 %v368_v16, %v368_v16 }
 0x159   :  { %v364_v18 = vpop.f32.mrf.mxu1  ;;  %480 = vmatmul.bf16.vlgmr.msra.gmra.mxu2 %v369_v17  ;;  %493 = vmatmul.bf16.vlgmr.msra.gmra.mxu3 %v369_v17 }
 0x1dc   :  { %v481_v31 = vpop.f32.mrf.mxu2  ;;  %v494_v32 = vpop.f32.mrf.mxu3 }
 0x1dd   :  { %v482_v33 = vadd.f32 %v481_v31, %v388_v28  ;;  %v495_v34 = vadd.f32 %v494_v32, %v389_v29 }
 0x1df   :  { %498 = vst [vmem:[#allocation20] sm:$0xff] %v482_v33  ;;  %v500_v36 = vmul.f32 0.5, %v495_v34 }
 0x1e0   :  { %499 = vst [vmem:[#allocation22] sm:$0xff] %v495_v34  ;;  %780 = dma.vmem_to_hbm [thread:$0]  %s776_s12, 128, %s778_s17, [#allocation21]  }
 0x1e1   :  { %v501_v37 = vmul.f32 1.442695, %v500_v36  ;;  %791 = dma.vmem_to_hbm [thread:$0]  %s787_s4, 128, %s789_s5, [#allocation21]  }
 0x1e3   :  { %1114 = vpow2.f32 %v501_v37 }
 0x1e4   :  { %v483_v39 = vpop.f32.mrf.mxu2  ;;  %v496_v40 = vpop.f32.mrf.mxu3 }
 0x1e9   :  { %v1115_v42 = vpop.eup %1114 }
 0x1ea   :  { %v504_v43 = vmul.f32 %v1115_v42, %v503_v41 }
 0x1ec   :  { %v505_v44 = vadd.f32 %v504_v43, %v482_v33 }
 0x1ee   :  { %v506_v45 = vpack.c.bf16 %v505_v44, %v505_v44 }
 0x1f0   :  { %583 = vmatmul.bf16.vlgmr.msrb.gmra.mxu0 %v506_v45 }
 0x26d   :  { %v584_v55 = vpop.f32.mrf.mxu0 }
 0x26e   :  { %v585_v56 = vadd.f32 %v1111_v54, %v584_v55 }
 0x270   :  { %vm588_vm2 = vcmp.ge.f32.partialorder %v585_v56, 0.0  ;;  %v589_v57 = vmul.f32 0.01, %v585_v56 }
 0x272   :  { %v590_v58 = vsel %vm588_vm2, %v585_v56, %v589_v57 }
 0x273   :  { %v591_v59 = vpack.c.bf16 %v590_v58, %v590_v58 }
 0x275   :  { %v586_v60 = vpop.f32.mrf.mxu0  ;;  %668 = vmatmul.bf16.vlgmr.msrb.gmra.mxu1 %v591_v59 }
 0x2f2   :  { %v669_v0 = vpop.f32.mrf.mxu1 }
 0x2f3   :  { %v670_v1 = vadd.f32 %v1112_v63, %v669_v0 }
 0x2f5   :  { %vm673_vm3 = vcmp.ge.f32.partialorder %v670_v1, 0.0  ;;  %v674_v2 = vmul.f32 0.01, %v670_v1 }
 0x2f7   :  { %v675_v3 = vsel %vm673_vm3, %v670_v1, %v674_v2 }
 0x2f8   :  { %v676_v4 = vpack.c.bf16 %v675_v3, %v675_v3 }
 0x2fa   :  { %v671_v5 = vpop.f32.mrf.mxu1  ;;  %753 = vmatmul.bf16.vlgmr.msrb.gmra.mxu2 %v676_v4 }
 0x37d   :  { %v754_v7 = vpop.f32.mrf.mxu2 }
 0x37e   :  { %v755_v8 = vadd.f32 %v1113_v6, %v754_v7 }
 0x380   :  { %758 = vst [vmem:[#allocation19] sm:$0xff] %v755_v8 }
 0x381   :  { %769 = dma.vmem_to_hbm [thread:$0]  %s765_s20, 128, %s767_s15, [#allocation4]  }
 0x385   :  { %v756_v9 = vpop.f32.mrf.mxu2 }
 0x386   :  { %1440 = dma.done.wait [#allocation4], 128  }
 0x387   :  { %1441 = vsyncadd [#allocation4], 4294967168 }
 0x388   :  { %1442 = dma.done.wait [#allocation21], 256  }
 0x389   :  { %1443 = vsyncadd [#allocation21], 4294967040 }
 0x38a   :  { %804 = vsyncpa [#allocation3], 1 }
 0x38b   :  { %805 = vsyncpa [#allocation6], 1 }
 0x38c   :  { %806 = vsyncpa [#allocation9], 1 }
 0x38d   :  { %807 = vsyncpa [#allocation12], 1 }
 0x38e   :  { %808 = vsyncpa [#allocation15], 1 }
 0x38f   :  { %809 = vsyncpa [#allocation18], 1 }
 0x390   :  { %810 = vsyncpa [#allocation4], 1 }
 0x391   :  { %811 = vsyncpa [#allocation21], 1 }

</bundles_post_ra>
